<compile_context>
chip_gen: v7x
topology: tpu7x:2x2x1
jax: 0.10.0
libtpu: 0.0.40
codegen_flags: <defaults>
</compile_context>

<pallas_src>
import functools

import jax
import jax.numpy as jnp
from jax.experimental import pallas as pl
from jax.experimental.pallas import tpu as pltpu


def _cdiv(a, b):
    return -(-a // b)


def _round_up(x, m):
    return _cdiv(x, m) * m


def _mlp_kernel(n_mid, has_context, *refs):
    """Fused DenseNN forward for one batch tile, batch-on-lanes layout.

    Activations are (features, TM): features on sublanes, batch on lanes, so every
    vreg is lane-dense and the (out_dim, TM) output store is unmasked.

    refs = [xT, (cT)?, w0x, (w0c)?, b0, w1, b1, ..., w_last, b_last, out]
    Weights are torch-orientation (out, in); biases are (out, 1) columns.
    """
    idx = 0
    x_ref = refs[idx]; idx += 1
    c_ref = None
    if has_context:
        c_ref = refs[idx]; idx += 1
    w0x_ref = refs[idx]; idx += 1
    w0c_ref = None
    if has_context:
        w0c_ref = refs[idx]; idx += 1
    b0_ref = refs[idx]; idx += 1
    o_ref = refs[-1]

    # --- layer 0: 'concatenate' personalization fused as a split matmul ------------
    #   hT = W0[:, :dim_x] @ xT + W0[:, dim_x:] @ cT + b0
    h = jnp.dot(w0x_ref[...], x_ref[...], preferred_element_type=jnp.float32)
    if has_context:
        h = h + jnp.dot(w0c_ref[...], c_ref[...], preferred_element_type=jnp.float32)
    h = jnp.maximum(h + b0_ref[...], 0.0)          # ReLU after every Linear

    # --- middle layers (Python-unrolled; bias read once per layer) -----------------
    for _ in range(n_mid):
        w_ref = refs[idx]
        b_ref = refs[idx + 1]
        idx += 2
        h = jnp.dot(w_ref[...], h, preferred_element_type=jnp.float32)
        h = jnp.maximum(h + b_ref[...], 0.0)

    # --- last layer: (out_dim, hidden) @ (hidden, TM) -------------------------------
    # For the scalar head (out_dim == 1) this is a single MXU push whose (1, TM)
    # result is already lane-dense and feeds an unmasked store.
    wl_ref = refs[idx]
    bl_ref = refs[idx + 1]
    out = jnp.dot(wl_ref[...], h, preferred_element_type=jnp.float32) + bl_ref[...]
    out = jnp.maximum(out, 0.0)                    # ReLU after the last Linear too
    # output_activation = Identity, output_bounds = None -> nothing else to do.
    o_ref[...] = out.astype(o_ref.dtype)


def personalized_scalar_nn_forward(x, context, weights, biases,
                                   personalization="concatenate",
                                   block_batch=2048):
    """weights[i]: (in_i, out_i) (== torch weight.T); biases[i]: (1, out_i) or (out_i,)."""
    assert len(weights) >= 2, "kernel expects at least two Linear layers"

    has_context = personalization == "concatenate" and context is not None
    batch, dim_x = x.shape
    dim_p = context.shape[-1] if has_context else 0
    assert weights[0].shape[0] == dim_x + dim_p
    out_dim = weights[-1].shape[1]

    # --- batch-on-lanes layout (trace-time transposes of tiny arrays) ---------------
    xT = x.T                                              # (dim_x, batch)
    cT = context.T if has_context else None               # (dim_p, batch)
    w0x = weights[0][:dim_x, :].T                         # (h0, dim_x)
    w0c = weights[0][dim_x:, :].T if has_context else None  # (h0, dim_p)
    b0 = jnp.reshape(biases[0], (-1, 1))                  # (h0, 1)
    mids = [(w.T, jnp.reshape(b, (-1, 1)))
            for w, b in zip(weights[1:-1], biases[1:-1])]
    w_last = weights[-1].T                                # (out_dim, hidden)
    b_last = jnp.reshape(biases[-1], (-1, 1))             # (out_dim, 1)

    # --- batch tiling: padding-aware, lane-aligned TM (multiple of 128) -------------
    n_tiles = max(1, _cdiv(batch, block_batch))
    tm = _round_up(_cdiv(batch, n_tiles), 128)
    b_pad = tm * n_tiles
    if b_pad != batch:
        pad = b_pad - batch
        xT = jnp.pad(xT, ((0, 0), (0, pad)))
        if has_context:
            cT = jnp.pad(cT, ((0, 0), (0, pad)))
    grid = (n_tiles,)

    # --- kernel args / specs ---------------------------------------------------------
    args = [xT]
    in_specs = [pl.BlockSpec((dim_x, tm), lambda i: (0, i))]
    if has_context:
        args.append(cT)
        in_specs.append(pl.BlockSpec((dim_p, tm), lambda i: (0, i)))

    def resident(a):
        # Full-array block with a constant index_map -> fetched once, stays in VMEM
        # across all grid steps.
        args.append(a)
        in_specs.append(pl.BlockSpec(a.shape, lambda i: (0, 0)))

    resident(w0x)
    if has_context:
        resident(w0c)
    resident(b0)
    for w, b in mids:
        resident(w)
        resident(b)
    resident(w_last)
    resident(b_last)

    # Lane-dense output slab: (out_dim, b_pad); one unmasked (out_dim, TM) store/tile.
    out_shape = jax.ShapeDtypeStruct((out_dim, b_pad), jnp.float32)
    out_spec = pl.BlockSpec((out_dim, tm), lambda i: (0, i))

    # Advisory cost estimate so XLA can overlap this small custom call with neighbors.
    flops = 2 * b_pad * sum(int(w.shape[0]) * int(w.shape[1]) for w in weights)
    bytes_accessed = 4 * (b_pad * (dim_x + dim_p + out_dim)
                          + sum(int(w.size) for w in weights)
                          + sum(int(b.size) for b in biases))
    cost = pl.CostEstimate(flops=flops, transcendentals=0,
                           bytes_accessed=bytes_accessed)

    kernel = functools.partial(_mlp_kernel, len(weights) - 2, has_context)

    out = pl.pallas_call(
        kernel,
        out_shape=out_shape,
        grid_spec=pltpu.PrefetchScalarGridSpec(
            num_scalar_prefetch=0,
            grid=grid,
            in_specs=in_specs,
            out_specs=out_spec,
        ),
        compiler_params=pltpu.CompilerParams(
            # Batch tiles are independent -> v7x's 2 TensorCores can split them.
            dimension_semantics=("parallel",),
        ),
        cost_estimate=cost,
    )(*args)
    # (out_dim, b_pad) -> (batch, out_dim); for out_dim == 1 this is a free reshape.
    return out[:, :batch].T


def _init_linear_params(key, dim_layers):
    """Deterministic PyTorch-style init: U(-1/sqrt(fan_in), 1/sqrt(fan_in))."""
    weights, biases = [], []
    for l, r in zip(dim_layers[:-1], dim_layers[1:]):
        key, kw, kb = jax.random.split(key, 3)
        bound = 1.0 / float(l) ** 0.5
        w = jax.random.uniform(kw, (l, r), jnp.float32, -bound, bound)  # (in, out)
        b = jax.random.uniform(kb, (1, r), jnp.float32, -bound, bound)
        weights.append(w)
        biases.append(b)
    return weights, biases


def _reference_forward(x, context, weights, biases, personalization="concatenate"):
    """Pure-JAX reference of the PyTorch forward for verification."""
    h = x
    if personalization == "concatenate" and context is not None:
        h = jnp.concatenate([x, context], axis=-1)
    for w, b in zip(weights, biases):
        h = jnp.maximum(h @ w + jnp.reshape(b, (1, -1)), 0.0)
    return h


if __name__ == "__main__":
    key = jax.random.PRNGKey(0)

    batch = 8
    dim_x = 8                 # raw feature dim
    dim_personalization = 4   # context dim (personalization == 'concatenate')
    hidden = 32
    # PersonalizedScalarNN(dim_x + dim_personalization, hidden, hidden, 1,
    #                      personalization='concatenate', dim_personalization=4)
    dim_layers = (dim_x + dim_personalization, hidden, hidden, 1)

    key, kx, kc, kp = jax.random.split(key, 4)
    x = jax.random.normal(kx, (batch, dim_x), jnp.float32)
    context = jax.random.normal(kc, (batch, dim_personalization), jnp.float32)
    weights, biases = _init_linear_params(kp, dim_layers)

    out = personalized_scalar_nn_forward(x, context, weights, biases,
                                         personalization="concatenate")
    out = jax.block_until_ready(out)
    ref = _reference_forward(x, context, weights, biases)
    assert out.shape == (batch, 1)
    assert jnp.allclose(out, ref, atol=1e-5, rtol=1e-5)

    # Exercise the multi-tile / pipelined path with a non-multiple batch.
    # Padding-aware TM: 600 rows -> 3 tiles of 256 (168 padded cols), not 2x512 -> 1024.
    big_batch = 600
    key, kx2, kc2 = jax.random.split(key, 3)
    xb = jax.random.normal(kx2, (big_batch, dim_x), jnp.float32)
    cb = jax.random.normal(kc2, (big_batch, dim_personalization), jnp.float32)
    out_b = personalized_scalar_nn_forward(xb, cb, weights, biases,
                                           personalization="concatenate",
                                           block_batch=256)
    out_b = jax.block_until_ready(out_b)
    ref_b = _reference_forward(xb, cb, weights, biases)
    assert out_b.shape == (big_batch, 1)
    assert jnp.allclose(out_b, ref_b, atol=1e-4, rtol=1e-4)

    print("KERNEL_OK")
</pallas_src>

<mosaic_0001>
module attributes {stable_mosaic.version = 11 : i64} {
  func.func @_mlp_kernel(%arg0: i32, %arg1: memref<8x128xf32, #tpu.memory_space<vmem>>, %arg2: memref<4x128xf32, #tpu.memory_space<vmem>>, %arg3: memref<32x8xf32, #tpu.memory_space<vmem>>, %arg4: memref<32x4xf32, #tpu.memory_space<vmem>>, %arg5: memref<32x1xf32, #tpu.memory_space<vmem>>, %arg6: memref<32x32xf32, #tpu.memory_space<vmem>>, %arg7: memref<32x1xf32, #tpu.memory_space<vmem>>, %arg8: memref<1x32xf32, #tpu.memory_space<vmem>>, %arg9: memref<1x1xf32, #tpu.memory_space<vmem>>, %arg10: memref<1x128xf32, #tpu.memory_space<vmem>>) attributes {dimension_semantics = [#tpu.dimension_semantics<parallel>], iteration_bounds = array<i64: 1>, scalar_prefetch = 0 : i64, scratch_operands = 0 : i64, tpu.core_type = #tpu.core_type<tc>, window_params = [{transform_indices = @transform_0, window_bounds = array<i64: 8, 128>}, {transform_indices = @transform_1, window_bounds = array<i64: 4, 128>}, {pipeline_mode = #tpu.pipeline_mode<synchronous>, transform_indices = @transform_2, window_bounds = array<i64: 32, 8>}, {pipeline_mode = #tpu.pipeline_mode<synchronous>, transform_indices = @transform_3, window_bounds = array<i64: 32, 4>}, {pipeline_mode = #tpu.pipeline_mode<synchronous>, transform_indices = @transform_4, window_bounds = array<i64: 32, 1>}, {pipeline_mode = #tpu.pipeline_mode<synchronous>, transform_indices = @transform_5, window_bounds = array<i64: 32, 32>}, {pipeline_mode = #tpu.pipeline_mode<synchronous>, transform_indices = @transform_6, window_bounds = array<i64: 32, 1>}, {pipeline_mode = #tpu.pipeline_mode<synchronous>, transform_indices = @transform_7, window_bounds = array<i64: 1, 32>}, {pipeline_mode = #tpu.pipeline_mode<synchronous>, transform_indices = @transform_8, window_bounds = array<i64: 1, 1>}, {transform_indices = @transform_9, window_bounds = array<i64: 1, 128>}]} {
    %c0 = arith.constant 0 : index
    %c0_0 = arith.constant 0 : index
    %0 = vector.load %arg3[%c0, %c0_0] : memref<32x8xf32, #tpu.memory_space<vmem>>, vector<32x8xf32>
    %c0_1 = arith.constant 0 : index
    %c0_2 = arith.constant 0 : index
    %1 = vector.load %arg1[%c0_1, %c0_2] : memref<8x128xf32, #tpu.memory_space<vmem>>, vector<8x128xf32>
    %cst = arith.constant dense<0.000000e+00> : vector<32x128xf32>
    %2 = tpu.matmul %0, %1, %cst {dimension_numbers = #tpu.dot_dimension_numbers<[1], [0], [0], [1], [0, 0, 1, 1], [], []>} : vector<32x8xf32>, vector<8x128xf32>, vector<32x128xf32> -> vector<32x128xf32>
    %c0_3 = arith.constant 0 : index
    %c0_4 = arith.constant 0 : index
    %3 = vector.load %arg4[%c0_3, %c0_4] : memref<32x4xf32, #tpu.memory_space<vmem>>, vector<32x4xf32>
    %c0_5 = arith.constant 0 : index
    %c0_6 = arith.constant 0 : index
    %4 = vector.load %arg2[%c0_5, %c0_6] : memref<4x128xf32, #tpu.memory_space<vmem>>, vector<4x128xf32>
    %cst_7 = arith.constant dense<0.000000e+00> : vector<32x128xf32>
    %5 = tpu.matmul %3, %4, %cst_7 {dimension_numbers = #tpu.dot_dimension_numbers<[1], [0], [0], [1], [0, 0, 1, 1], [], []>} : vector<32x4xf32>, vector<4x128xf32>, vector<32x128xf32> -> vector<32x128xf32>
    %6 = arith.addf %2, %5 : vector<32x128xf32>
    %c0_8 = arith.constant 0 : index
    %c0_9 = arith.constant 0 : index
    %7 = vector.load %arg5[%c0_8, %c0_9] : memref<32x1xf32, #tpu.memory_space<vmem>>, vector<32x1xf32>
    %8 = vector.broadcast %7 : vector<32x1xf32> to vector<32x128xf32>
    %9 = arith.addf %6, %8 : vector<32x128xf32>
    %cst_10 = arith.constant 0.000000e+00 : f32
    %10 = vector.broadcast %cst_10 : f32 to vector<32x128xf32>
    %11 = arith.maximumf %9, %10 : vector<32x128xf32>
    %c0_11 = arith.constant 0 : index
    %c0_12 = arith.constant 0 : index
    %12 = vector.load %arg6[%c0_11, %c0_12] : memref<32x32xf32, #tpu.memory_space<vmem>>, vector<32x32xf32>
    %cst_13 = arith.constant dense<0.000000e+00> : vector<32x128xf32>
    %13 = tpu.matmul %12, %11, %cst_13 {dimension_numbers = #tpu.dot_dimension_numbers<[1], [0], [0], [1], [0, 0, 1, 1], [], []>} : vector<32x32xf32>, vector<32x128xf32>, vector<32x128xf32> -> vector<32x128xf32>
    %c0_14 = arith.constant 0 : index
    %c0_15 = arith.constant 0 : index
    %14 = vector.load %arg7[%c0_14, %c0_15] : memref<32x1xf32, #tpu.memory_space<vmem>>, vector<32x1xf32>
    %15 = vector.broadcast %14 : vector<32x1xf32> to vector<32x128xf32>
    %16 = arith.addf %13, %15 : vector<32x128xf32>
    %cst_16 = arith.constant 0.000000e+00 : f32
    %17 = vector.broadcast %cst_16 : f32 to vector<32x128xf32>
    %18 = arith.maximumf %16, %17 : vector<32x128xf32>
    %c0_17 = arith.constant 0 : index
    %c0_18 = arith.constant 0 : index
    %19 = vector.load %arg8[%c0_17, %c0_18] : memref<1x32xf32, #tpu.memory_space<vmem>>, vector<1x32xf32>
    %cst_19 = arith.constant dense<0.000000e+00> : vector<1x128xf32>
    %20 = tpu.matmul %19, %18, %cst_19 {dimension_numbers = #tpu.dot_dimension_numbers<[1], [0], [0], [1], [0, 0, 1, 1], [], []>} : vector<1x32xf32>, vector<32x128xf32>, vector<1x128xf32> -> vector<1x128xf32>
    %c0_20 = arith.constant 0 : index
    %c0_21 = arith.constant 0 : index
    %21 = vector.load %arg9[%c0_20, %c0_21] : memref<1x1xf32, #tpu.memory_space<vmem>>, vector<1x1xf32>
    %22 = vector.broadcast %21 : vector<1x1xf32> to vector<1x128xf32>
    %23 = arith.addf %20, %22 : vector<1x128xf32>
    %cst_22 = arith.constant 0.000000e+00 : f32
    %24 = vector.broadcast %cst_22 : f32 to vector<1x128xf32>
    %25 = arith.maximumf %23, %24 : vector<1x128xf32>
    %c0_23 = arith.constant 0 : index
    %c0_24 = arith.constant 0 : index
    %26 = vector.load %arg10[%c0_23, %c0_24] : memref<1x128xf32, #tpu.memory_space<vmem>>, vector<1x128xf32>
    tpu.vector_store %arg10[%c0_23, %c0_24], %25 {strides = array<i32>} : memref<1x128xf32, #tpu.memory_space<vmem>>, vector<1x128xf32>,
    return
  }
  func.func @transform_0(%arg0: i32) -> (i32, i32) {
    %c0_i32 = arith.constant 0 : i32
    %c0_i32_0 = arith.constant 0 : i32
    return %c0_i32, %arg0 : i32, i32
  }
  func.func @transform_1(%arg0: i32) -> (i32, i32) {
    %c0_i32 = arith.constant 0 : i32
    %c0_i32_0 = arith.constant 0 : i32
    return %c0_i32, %arg0 : i32, i32
  }
  func.func @transform_2(%arg0: i32) -> (i32, i32) {
    %c0_i32 = arith.constant 0 : i32
    %c0_i32_0 = arith.constant 0 : i32
    %c0_i32_1 = arith.constant 0 : i32
    return %c0_i32, %c0_i32_0 : i32, i32
  }
  func.func @transform_3(%arg0: i32) -> (i32, i32) {
    %c0_i32 = arith.constant 0 : i32
    %c0_i32_0 = arith.constant 0 : i32
    %c0_i32_1 = arith.constant 0 : i32
    return %c0_i32, %c0_i32_0 : i32, i32
  }
  func.func @transform_4(%arg0: i32) -> (i32, i32) {
    %c0_i32 = arith.constant 0 : i32
    %c0_i32_0 = arith.constant 0 : i32
    %c0_i32_1 = arith.constant 0 : i32
    return %c0_i32, %c0_i32_0 : i32, i32
  }
  func.func @transform_5(%arg0: i32) -> (i32, i32) {
    %c0_i32 = arith.constant 0 : i32
    %c0_i32_0 = arith.constant 0 : i32
    %c0_i32_1 = arith.constant 0 : i32
    return %c0_i32, %c0_i32_0 : i32, i32
  }
  func.func @transform_6(%arg0: i32) -> (i32, i32) {
    %c0_i32 = arith.constant 0 : i32
    %c0_i32_0 = arith.constant 0 : i32
    %c0_i32_1 = arith.constant 0 : i32
    return %c0_i32, %c0_i32_0 : i32, i32
  }
  func.func @transform_7(%arg0: i32) -> (i32, i32) {
    %c0_i32 = arith.constant 0 : i32
    %c0_i32_0 = arith.constant 0 : i32
    %c0_i32_1 = arith.constant 0 : i32
    return %c0_i32, %c0_i32_0 : i32, i32
  }
  func.func @transform_8(%arg0: i32) -> (i32, i32) {
    %c0_i32 = arith.constant 0 : i32
    %c0_i32_0 = arith.constant 0 : i32
    %c0_i32_1 = arith.constant 0 : i32
    return %c0_i32, %c0_i32_0 : i32, i32
  }
  func.func @transform_9(%arg0: i32) -> (i32, i32) {
    %c0_i32 = arith.constant 0 : i32
    %c0_i32_0 = arith.constant 0 : i32
    return %c0_i32, %arg0 : i32, i32
  }
}

</mosaic_0001>

<bundles_post_ra>
// kernel: tpu_custom_call.1
= control target key start
LH: loop header
LB: loop body
LE: loop exit
PB: predicated region body
PF: predicated region fallthrough
CT: control target
= control target key end

     0   :  { %s786_s0 = inlined_call_operand.vmem [shape: f32[8,128], index: 0, kind: input, shape index: {}]   ;;  %s787_s1 = inlined_call_operand.vmem [shape: f32[4,128], index: 1, kind: input, shape index: {}]   ;;  %s788_s2 = inlined_call_operand.vmem [shape: f32[32,8], index: 2, kind: input, shape index: {}]   ;;  %s789_s3 = inlined_call_operand.vmem [shape: f32[32,4], index: 3, kind: input, shape index: {}]   ;;  %s790_s4 = inlined_call_operand.vmem [shape: f32[32,1], index: 4, kind: input, shape index: {}]   ;;  %s791_s5 = inlined_call_operand.vmem [shape: f32[32,32], index: 5, kind: input, shape index: {}]   ;;  %s792_s6 = inlined_call_operand.vmem [shape: f32[32,1], index: 6, kind: input, shape index: {}]   ;;  %s793_s7 = inlined_call_operand.vmem [shape: f32[1,32], index: 7, kind: input, shape index: {}]   ;;  %s794_s8 = inlined_call_operand.<no memory space> [shape: f32[1,1], index: 8, kind: input, shape index: {}]   ;;  %s795_s9 = inlined_call_operand.hbm [shape: f32[1,128], index: 9, kind: output, shape index: {}]  }
   0x1   :  { %v14_v0 = vstv %s794_s8 }
   0x2   :  { %15 = vst [vmem:[#allocation2] sm:$0x1] %v14_v0 }
   0x3   :  { %v44_v1 = vld [vmem:[%s787_s1] sm:$0xf]  ;;  %vm58_vm0 = vcmask 1043456   ;;  %vm45_vm1 = vcmask 31744   ;;  %v41_v3 = vld [vmem:[%s789_s3 + $0x8] sm:$0xff]  ;;  %v42_v5 = vld [vmem:[%s789_s3 + $0x10] sm:$0xff] }
   0x4   :  { %v40_v2 = vld [vmem:[%s789_s3] sm:$0xff]  ;;  %544 = vmatprep.subr.msk.mxu0 %vm58_vm0, %v44_v1  ;;  %v634_v6 = vmov 0   ;;  %v43_v8 = vld [vmem:[%s789_s3 + $0x18] sm:$0xff]  ;;  %v247_v9 = vld [vmem:[%s790_s4 + $0x10] sm:$0xff]  ;;  %vm147_vm2 = vcmask 64512  }
   0x5   :  { %546 = vmatprep.mubr.msk.f32.mxu0 %vm45_vm1, %v40_v2  ;;  %v39_v4 = vld [vmem:[%s786_s0] sm:$0xff]  ;;  %545 = vmatpush3.msk.msra.mxu0 %vm58_vm0, %v44_v1  ;;  %v246_v11 = vld [vmem:[%s790_s4 + $0x8] sm:$0xff] }
   0x6   :  { %608 = vset.pattern.permute.xlu0 %v634_v6  ;;  %547 = vmatmul.mubr.msk.f32.vlgmr.msra.gmra.mrb[0].mxu0 %vm45_vm1, %v41_v3  ;;  %v245_v7 = vld [vmem:[%s790_s4] sm:$0xff] }
   0x7   :  { %552 = vmatprep.subr.mxu0 %v39_v4  ;;  %549 = vmatprep.mubr.msk.f32.mxu0 %vm45_vm1, %v42_v5  ;;  %v35_v10 = vld [vmem:[%s788_s2] sm:$0xff] }
   0x8   :  { %553 = vmatpush3.msra.mxu0 %v39_v4  ;;  %251 = vperm.xlu0 %608, %v245_v7  }
   0x9   :  { %609 = vset.pattern.permute.xlu1 %v634_v6 }
   0xa   :  { %261 = vperm.xlu1 %609, %v247_v9  }
   0xb   :  { %16 = vsyncpa [#allocation4], 0  ;;  %550 = vmatmul.mubr.msk.f32.gmra.mrb[2].mxu0 %vm45_vm1, %v43_v8  ;;  %v248_v12 = vld [vmem:[%s790_s4 + $0x18] sm:$0xff]  ;;  %v36_v13 = vld [vmem:[%s788_s2 + $0x8] sm:$0xff]  ;;  %vm305_vm3 = vcmask 261120   ;;  %v635_v43 = vmov 0.0|0.0   ;;  %v414_v0 = vlaneseq }
   0xc   :  { %554 = vmatprep.mubr.msk.f32.mxu0 %vm147_vm2, %v35_v10  ;;  %v37_v14 = vld [vmem:[%s788_s2 + $0x10] sm:$0xff]  ;;  %256 = vperm.xlu0 %608, %v246_v11   ;;  %v281_v15 = vld [vmem:[%s792_s6] sm:$0xff]  ;;  %v282_v16 = vld [vmem:[%s792_s6 + $0x8] sm:$0xff]  ;;  %vm636_vm4 = vmmov 0   ;;  %v637_v44 = vmov 0.0   ;;  %s638_s25 = smov [#allocation3]  }
   0xd   :  { %v38_v17 = vld [vmem:[%s788_s2 + $0x18] sm:$0xff]  ;;  %v283_v18 = vld [vmem:[%s792_s6 + $0x10] sm:$0xff]  ;;  %v408_v20 = vld [vmem:[#allocation2] sm:$0x1]  ;;  %v415_v1 = vshrl.u32 %v414_v0, 7  ;;  %s499_s26 = sshll.u32 %s638_s25, 4  ;;  %s500_s26 = int_to_ptr.vmem [resolvable:$true] %s499_s26 }
   0xe   :  { %266 = vperm.xlu1 %609, %v248_v12   ;;  %v284_v19 = vld [vmem:[%s792_s6 + $0x18] sm:$0xff]  ;;  %v277_v21 = vld [vmem:[%s791_s5] sm:$0xff]  ;;  %v278_v40 = vld [vmem:[%s791_s5 + $0x8] sm:$0xff]  ;;  %s610_s27 = scalar_lea.vmem %s500_s26, 16  ;;  %s614_s3 = scalar_lea.vmem %s500_s26, 32 }
   0xf   :  { %555 = vmatmul.mubr.msk.f32.vlgmr.msra.gmra.mrb[0].mxu0 %vm147_vm2, %v36_v13  ;;  %568 = vmatprep.mubr.msk.f32.mxu1 %vm305_vm3, %v277_v21  ;;  %v279_v41 = vld [vmem:[%s791_s5 + $0x10] sm:$0xff]  ;;  %v280_v42 = vld [vmem:[%s791_s5 + $0x18] sm:$0xff]  ;;  %v407_v63 = vld [vmem:[%s793_s7] sm:$0x1]  ;;  %v416_v2 = vsub.s32 0, %v415_v1  ;;  %p611_p0 = scmp.ne.s32.totalorder %s500_s26, %s610_s27  ;;  %p615_p1 = scmp.lt.s32.totalorder %s500_s26, %s500_s26 }
  0x10   :  { %557 = vmatprep.mubr.msk.f32.mxu0 %vm147_vm2, %v37_v14  ;;  %287 = vperm.xlu0 %608, %v281_v15   ;;  %p616_p2 = scmp.lt.s32.totalorder %s614_s3, %s610_s27 }
  0x12   :  { %292 = vperm.xlu1 %609, %v282_v16   ;;  %p617_p3 = por %p616_p2, %p615_p1 }
  0x13   :  { %558 = vmatmul.mubr.msk.f32.gmra.mrb[2].mxu0 %vm147_vm2, %v38_v17 }
  0x14   :  { %297 = vperm.xlu0 %608, %v283_v18   ;;  %p618_p4 = pnand %p617_p3, %p611_p0 }
  0x16   :  { %302 = vperm.xlu1 %609, %v284_v19  }
  0x18   :  { %411 = vperm.xlu0 %608, %v408_v20  }
  0x87   :  { %v252_v22 = vpop.permute.xlu0 %251 }
  0x89   :  { %v262_v23 = vpop.permute.xlu1 %261 }
  0x8b   :  { %v257_v24 = vpop.permute.xlu0 %256 }
  0x8d   :  { %v267_v30 = vpop.permute.xlu1 %266 }
  0x8f   :  { %v288_v46 = vpop.permute.xlu0 %287 }
  0x91   :  { %v293_v45 = vpop.permute.xlu1 %292 }
  0x93   :  { %v298_v55 = vpop.permute.xlu0 %297 }
  0x95   :  { %v303_v52 = vpop.permute.xlu1 %302 }
  0x97   :  { %v412_v3 = vpop.permute.xlu0 %411 }
  0x98   :  { %v417_v4 = vrot.slane %v412_v3, %v416_v2 }
  0xe2   :  { %v556_v25 = vpop.f32.mrb[0].mxu0 }
  0xe3   :  { %v270_v26 = vadd.f32 %v556_v25, %v257_v24  ;;  %v226_v27 = vpop.f32.mrb[1].mxu0 }
  0xe4   :  { %v269_v28 = vadd.f32 %v252_v22, %v226_v27 }
  0xe5   :  { %v274_v29 = vmax.f32 %v270_v26, 0.0 }
  0xe6   :  { %v273_v31 = vmax.f32 %v269_v28, 0.0  ;;  %v559_v32 = vpop.f32.mrb[2].mxu0 }
  0xe7   :  { %v272_v33 = vadd.f32 %v559_v32, %v267_v30  ;;  %v236_v34 = vpop.f32.mrb[3].mxu0 }
  0xe8   :  { %v271_v35 = vadd.f32 %v262_v23, %v236_v34  ;;  %v585_v36 = vpack.c.bf16 %v274_v29, %v273_v31 }
  0xe9   :  { %v276_v37 = vmax.f32 %v272_v33, 0.0 }
  0xea   :  { %v275_v38 = vmax.f32 %v271_v35, 0.0  ;;  %586 = vmatprep.subr.bf16.mxu1 %v585_v36 }
  0xeb   :  { %588 = vmatpush3.bf16.msra.mxu1 %v585_v36 }
  0xec   :  { %v589_v39 = vpack.c.bf16 %v276_v37, %v275_v38 }
  0xee   :  { %590 = vmatprep.subr.bf16.mxu1 %v589_v39 }
  0xef   :  { %592 = vmatpush3.bf16.msra.mxu1 %v589_v39 }
  0xf0   :  { %593 = vmatprep.subr.bf16.mxu1 %v635_v43 }
  0xf2   :  { %569 = vmatmul.mubr.msk.f32.vlgmr.msra.gmra.mrb[0].mxu1 %vm305_vm3, %v278_v40 }
  0xf3   :  { %571 = vmatprep.mubr.msk.f32.mxu1 %vm305_vm3, %v279_v41 }
  0xf6   :  { %572 = vmatmul.mubr.msk.f32.gmra.mrb[2].mxu1 %vm305_vm3, %v280_v42 }
  0xf7   :  { %582 = vmatprep.mubr.msk.f32.mxu1 %vm636_vm4, %v637_v44 }
 0x1c5   :  { %v570_v47 = vpop.f32.mrb[0].mxu1 }
 0x1c6   :  { %v390_v48 = vadd.f32 %v570_v47, %v293_v45  ;;  %v384_v49 = vpop.f32.mrb[1].mxu1 }
 0x1c7   :  { %v385_v50 = vadd.f32 %v384_v49, %v288_v46 }
 0x1c8   :  { %v404_v51 = vmax.f32 %v390_v48, 0.0 }
 0x1c9   :  { %v403_v53 = vmax.f32 %v385_v50, 0.0  ;;  %v573_v54 = vpop.f32.mrb[2].mxu1 }
 0x1ca   :  { %v400_v56 = vadd.f32 %v573_v54, %v303_v52  ;;  %v394_v57 = vpop.f32.mrb[3].mxu1 }
 0x1cb   :  { %v594_v58 = vpack.c.bf16 %v404_v51, %v403_v53  ;;  %v395_v59 = vadd.f32 %v394_v57, %v298_v55 }
 0x1cc   :  { %v406_v60 = vmax.f32 %v400_v56, 0.0 }
 0x1cd   :  { %v405_v61 = vmax.f32 %v395_v59, 0.0  ;;  %595 = vmatpush3.bf16.msra.mxu1 %v594_v58 }
 0x1ce   :  { %596 = vmatprep.subr.bf16.mxu1 %v635_v43 }
 0x1cf   :  { %v597_v62 = vpack.c.bf16 %v406_v60, %v405_v61 }
 0x1d1   :  { %598 = vmatpush3.bf16.msra.mxu1 %v597_v62 }
 0x1d4   :  { %583 = vmatmul.mubr.msk.f32.vlgmr.msra.gmra.mrb[4].mxu1 %vm305_vm3, %v407_v63 }
 0x2a7   :  { %v487_v5 = vpop.f32.mrb[4].mxu1 }
 0x2a8   :  { %v488_v6 = vadd.f32 %v487_v5, %v417_v4  ;;  %v584_v7 = vpop.f32.mrb[5].mxu1 }
 0x2aa   :  { %v491_v8 = vmax.f32 %v488_v6, 0.0 }
 0x2ac   :  { %492 = vst [vmem:[#allocation3] sm:$0x1] %v491_v8 }
 0x2ad   :  { %621 = shalt.err (!%p618_p4)
}
 0x2ae   :  { %s622_s29 = scalar_lea.hbm %s795_s9, 16 }
 0x2af   :  { %p623_p5 = scmp.ne.s32.totalorder %s795_s9, %s622_s29  ;;  %p626_p6 = scmp.lt.u32.totalorder %s622_s29, %s795_s9 }
 0x2b1   :  { %p628_p7 = pnand %p626_p6, %p623_p5 }
 0x2b3   :  { %631 = shalt.err (!%p628_p7)
}
 0x2b4   :  { %502 = dma.vmem_to_hbm [thread:$0]  %s500_s26, 16, %s795_s9, [#allocation4]  }
 0x2b5   :  { %632 = dma.done.wait [#allocation4], 16  }
 0x2b6   :  { %633 = vsyncadd [#allocation4], 4294967280 }
 0x2b7   :  { %506 = vsyncpa [#allocation4], 1 }

</bundles_post_ra>
